<compile_context>
chip_gen: v5e
topology: v5e:2x2
jax: 0.10.0
libtpu: 0.0.40
codegen_flags: <defaults>
</compile_context>

<pallas_src>
import functools

import jax
import jax.numpy as jnp
from jax.experimental import pallas as pl
from jax.experimental.pallas import tpu as pltpu


def _projector_kernel(x_ref, w_ref, b_ref, o_ref):
    # x_ref: (tm, H)      streamed row tile (double-buffered)
    # w_ref: (H, P)       VMEM-resident weight (single-buffered, read once)
    # b_ref: (1, P) f32   VMEM-resident bias
    # o_ref: (tm, P)
    acc = jnp.dot(x_ref[...], w_ref[...], preferred_element_type=jnp.float32)
    o_ref[...] = (acc + b_ref[...]).astype(o_ref.dtype)


@functools.partial(jax.jit, static_argnames=("tm", "operand_dtype"))
def paligemma_multimodal_projector(image_features, weight, bias, *, tm=512,
                                   operand_dtype=jnp.bfloat16):
    """image_features: [B, S, H]; weight: [P, H] (PyTorch nn.Linear layout); bias: [P].

    Returns [B, S, P] in image_features.dtype (accumulation is always f32).
    operand_dtype: dtype fed to the MXU (default bf16); None keeps input dtype.
    tm must be a multiple of 8 (or >= M); 512 recommended on v6e/v7x, 256 on v5e.
    """
    B, S, H = image_features.shape
    P, H_w = weight.shape
    assert H == H_w, (H, H_w)
    M = B * S
    out_dtype = image_features.dtype

    op_dtype = operand_dtype if operand_dtype is not None else image_features.dtype

    # One-time operand prep (weights are static in real use, so this is free
    # at weight-prep time; here it is a tiny XLA op vs. the matmul).
    x2d = image_features.reshape(M, H).astype(op_dtype)
    w_t = jnp.transpose(weight).astype(op_dtype)        # [H, P] — standard contraction
    b2d = bias.reshape(1, P).astype(jnp.float32)         # f32 once, not per grid step

    # Clamp the row tile to the array extent (small shapes / tests).  The
    # clamp is only legal because a clamped tile equals the full M dim.
    tm = min(tm, M)
    grid = (pl.cdiv(M, tm),)

    # Actual HBM traffic of this schedule: every operand read exactly once,
    # output written exactly once.
    bytes_accessed = (
        M * H * jnp.dtype(op_dtype).itemsize          # x
        + H * P * jnp.dtype(op_dtype).itemsize        # W (resident, read once)
        + P * 4                                       # bias (f32)
        + M * P * jnp.dtype(out_dtype).itemsize       # output
    )
    cost = pl.CostEstimate(
        flops=2 * M * H * P,
        transcendentals=0,
        bytes_accessed=bytes_accessed,
    )

    out2d = pl.pallas_call(
        _projector_kernel,
        out_shape=jax.ShapeDtypeStruct((M, P), out_dtype),
        grid_spec=pltpu.PrefetchScalarGridSpec(
            num_scalar_prefetch=0,
            grid=grid,
            in_specs=[
                # x rows: streamed, double-buffered.
                pl.BlockSpec((tm, H), lambda i: (i, 0)),
                # W: whole matrix, constant index -> DMA'd once, single buffer.
                pl.BlockSpec((H, P), lambda i: (0, 0),
                             pipeline_mode=pl.Buffered(1)),
                # bias: whole vector, resident, single buffer.
                pl.BlockSpec((1, P), lambda i: (0, 0),
                             pipeline_mode=pl.Buffered(1)),
            ],
            out_specs=pl.BlockSpec((tm, P), lambda i: (i, 0)),
        ),
        compiler_params=pltpu.CompilerParams(
            dimension_semantics=("parallel",),
            # Resident W + tm=512 tiles need ~15 MiB (bf16) / ~26 MiB (f32):
            # raise the scoped limit above v5e's 16 MiB default while staying
            # under v7x's 64 MiB physical VMEM.
            vmem_limit_bytes=48 << 20,
        ),
        cost_estimate=cost,
    )(x2d, w_t, b2d)

    return out2d.reshape(B, S, P)


if __name__ == "__main__":
    # Small synthetic config consistent with the module's Linear(H, P):
    # batch=2, num_patches(seq)=16, vision hidden_size=128, projection_dim=256.
    B, S, H, P = 2, 16, 128, 256

    key = jax.random.PRNGKey(0)
    k_x, k_w, k_b = jax.random.split(key, 3)

    image_features = jax.random.normal(k_x, (B, S, H), dtype=jnp.float32)
    weight = jax.random.normal(k_w, (P, H), dtype=jnp.float32) * 0.02
    bias = jax.random.normal(k_b, (P,), dtype=jnp.float32) * 0.01

    ref = image_features @ weight.T + bias

    # --- f32-operand path (tight tolerance) ---
    out_f32 = paligemma_multimodal_projector(
        image_features, weight, bias, operand_dtype=None)
    out_f32 = jax.block_until_ready(out_f32)
    assert out_f32.shape == (B, S, P)
    assert jnp.allclose(out_f32, ref, atol=1e-5, rtol=1e-5)

    # --- default production path: bf16 MXU operands, f32 accumulate ---
    out_bf16 = paligemma_multimodal_projector(image_features, weight, bias)
    out_bf16 = jax.block_until_ready(out_bf16)
    assert out_bf16.shape == (B, S, P)
    assert out_bf16.dtype == image_features.dtype
    assert jnp.allclose(out_bf16, ref, atol=5e-2, rtol=5e-2)

    print("KERNEL_OK")
</pallas_src>

<mosaic_0001>
module attributes {stable_mosaic.version = 11 : i64} {
  func.func @_projector_kernel(%arg0: i32, %arg1: memref<32x128xf32, #tpu.memory_space<vmem>>, %arg2: memref<128x256xf32, #tpu.memory_space<vmem>>, %arg3: memref<1x256xf32, #tpu.memory_space<vmem>>, %arg4: memref<32x256xf32, #tpu.memory_space<vmem>>) attributes {dimension_semantics = [#tpu.dimension_semantics<parallel>], iteration_bounds = array<i64: 1>, scalar_prefetch = 0 : i64, scratch_operands = 0 : i64, tpu.core_type = #tpu.core_type<tc>, window_params = [{transform_indices = @transform_0, window_bounds = array<i64: 32, 128>}, {pipeline_mode = #tpu.pipeline_mode<synchronous>, transform_indices = @transform_1, window_bounds = array<i64: 128, 256>}, {pipeline_mode = #tpu.pipeline_mode<synchronous>, transform_indices = @transform_2, window_bounds = array<i64: 1, 256>}, {transform_indices = @transform_3, window_bounds = array<i64: 32, 256>}]} {
    %c0 = arith.constant 0 : index
    %c0_0 = arith.constant 0 : index
    %0 = vector.load %arg1[%c0, %c0_0] : memref<32x128xf32, #tpu.memory_space<vmem>>, vector<32x128xf32>
    %c0_1 = arith.constant 0 : index
    %c0_2 = arith.constant 0 : index
    %1 = vector.load %arg2[%c0_1, %c0_2] : memref<128x256xf32, #tpu.memory_space<vmem>>, vector<128x256xf32>
    %cst = arith.constant dense<0.000000e+00> : vector<32x256xf32>
    %2 = tpu.matmul %0, %1, %cst {dimension_numbers = #tpu.dot_dimension_numbers<[1], [0], [0], [1], [0, 0, 1, 1], [], []>} : vector<32x128xf32>, vector<128x256xf32>, vector<32x256xf32> -> vector<32x256xf32>
    %c0_3 = arith.constant 0 : index
    %c0_4 = arith.constant 0 : index
    %3 = vector.load %arg3[%c0_3, %c0_4] : memref<1x256xf32, #tpu.memory_space<vmem>>, vector<1x256xf32>
    %4 = vector.broadcast %3 : vector<1x256xf32> to vector<32x256xf32>
    %5 = arith.addf %2, %4 : vector<32x256xf32>
    %c0_5 = arith.constant 0 : index
    %c0_6 = arith.constant 0 : index
    %6 = vector.load %arg4[%c0_5, %c0_6] : memref<32x256xf32, #tpu.memory_space<vmem>>, vector<32x256xf32>
    tpu.vector_store %arg4[%c0_5, %c0_6], %5 {strides = array<i32>} : memref<32x256xf32, #tpu.memory_space<vmem>>, vector<32x256xf32>,
    return
  }
  func.func @transform_0(%arg0: i32) -> (i32, i32) {
    %c0_i32 = arith.constant 0 : i32
    %c0_i32_0 = arith.constant 0 : i32
    return %arg0, %c0_i32 : i32, i32
  }
  func.func @transform_1(%arg0: i32) -> (i32, i32) {
    %c0_i32 = arith.constant 0 : i32
    %c0_i32_0 = arith.constant 0 : i32
    %c0_i32_1 = arith.constant 0 : i32
    return %c0_i32, %c0_i32_0 : i32, i32
  }
  func.func @transform_2(%arg0: i32) -> (i32, i32) {
    %c0_i32 = arith.constant 0 : i32
    %c0_i32_0 = arith.constant 0 : i32
    %c0_i32_1 = arith.constant 0 : i32
    return %c0_i32, %c0_i32_0 : i32, i32
  }
  func.func @transform_3(%arg0: i32) -> (i32, i32) {
    %c0_i32 = arith.constant 0 : i32
    %c0_i32_0 = arith.constant 0 : i32
    return %arg0, %c0_i32 : i32, i32
  }
}

</mosaic_0001>

<bundles_post_ra>
// kernel: paligemma_multimodal_projector.1
= control target key start
LH: loop header
LB: loop body
LE: loop exit
PB: predicated region body
PF: predicated region fallthrough
CT: control target
= control target key end

     0   :  { %s339_s0 = inlined_call_operand.vmem [shape: f32[32,128], index: 0, kind: input, shape index: {}]   ;;  %s340_s1 = inlined_call_operand.vmem [shape: f32[128,256], index: 1, kind: input, shape index: {}]   ;;  %s341_s2 = inlined_call_operand.vmem [shape: f32[1,256], index: 2, kind: input, shape index: {}]   ;;  %s342_s3 = inlined_call_operand.hbm [shape: f32[32,256], index: 3, kind: output, shape index: {}]  }
   0x1   :  { %v49_v0 = vld [vmem:[%s340_s1 + $0xf0] sm:$0xff]  ;;  %v50_v1 = vld [vmem:[%s340_s1 + $0xf8] sm:$0xff]  ;;  %v47_v2 = vld [vmem:[%s340_s1 + $0xe0] sm:$0xff] }
   0x2   :  { %141 = vmatpush.msra.mxu2 %v49_v0  ;;  %157 = vmatpush.msra.mxu3 %v50_v1  ;;  %v48_v3 = vld [vmem:[%s340_s1 + $0xe8] sm:$0xff]  ;;  %v45_v4 = vld [vmem:[%s340_s1 + $0xd0] sm:$0xff]  ;;  %v46_v5 = vld [vmem:[%s340_s1 + $0xd8] sm:$0xff] }
   0x3   :  { %57 = vmatpush.msra.mxu0 %v49_v0  ;;  %86 = vmatpush.msra.mxu1 %v50_v1  ;;  %v43_v6 = vld [vmem:[%s340_s1 + $0xc0] sm:$0xff]  ;;  %v44_v7 = vld [vmem:[%s340_s1 + $0xc8] sm:$0xff]  ;;  %v41_v8 = vld [vmem:[%s340_s1 + $0xb0] sm:$0xff] }
   0x4   :  { %142 = vmatpush.msra.mxu2 %v47_v2  ;;  %158 = vmatpush.msra.mxu3 %v48_v3  ;;  %v42_v9 = vld [vmem:[%s340_s1 + $0xb8] sm:$0xff]  ;;  %v39_v10 = vld [vmem:[%s340_s1 + $0xa0] sm:$0xff]  ;;  %v40_v11 = vld [vmem:[%s340_s1 + $0xa8] sm:$0xff] }
   0x5   :  { %58 = vmatpush.msra.mxu0 %v47_v2  ;;  %87 = vmatpush.msra.mxu1 %v48_v3  ;;  %v37_v12 = vld [vmem:[%s340_s1 + $0x90] sm:$0xff]  ;;  %v38_v13 = vld [vmem:[%s340_s1 + $0x98] sm:$0xff]  ;;  %v35_v14 = vld [vmem:[%s340_s1 + $0x80] sm:$0xff] }
   0x6   :  { %143 = vmatpush.msra.mxu2 %v45_v4  ;;  %159 = vmatpush.msra.mxu3 %v46_v5  ;;  %v36_v15 = vld [vmem:[%s340_s1 + $0x88] sm:$0xff] }
   0x7   :  { %59 = vmatpush.msra.mxu0 %v45_v4  ;;  %88 = vmatpush.msra.mxu1 %v46_v5 }
   0x8   :  { %144 = vmatpush.msra.mxu2 %v43_v6  ;;  %160 = vmatpush.msra.mxu3 %v44_v7 }
   0x9   :  { %60 = vmatpush.msra.mxu0 %v43_v6  ;;  %89 = vmatpush.msra.mxu1 %v44_v7 }
   0xa   :  { %145 = vmatpush.msra.mxu2 %v41_v8  ;;  %161 = vmatpush.msra.mxu3 %v42_v9 }
   0xb   :  { %61 = vmatpush.msra.mxu0 %v41_v8  ;;  %90 = vmatpush.msra.mxu1 %v42_v9 }
   0xc   :  { %146 = vmatpush.msra.mxu2 %v39_v10  ;;  %162 = vmatpush.msra.mxu3 %v40_v11 }
   0xd   :  { %62 = vmatpush.msra.mxu0 %v39_v10  ;;  %91 = vmatpush.msra.mxu1 %v40_v11 }
   0xe   :  { %8 = vsyncpa [#allocation3], 0  ;;  %147 = vmatpush.msra.mxu2 %v37_v12  ;;  %163 = vmatpush.msra.mxu3 %v38_v13  ;;  %v33_v16 = vld [vmem:[%s340_s1 + $0x70] sm:$0xff]  ;;  %v34_v17 = vld [vmem:[%s340_s1 + $0x78] sm:$0xff]  ;;  %s129_s6 = sshll.u32 %s342_s3, 4  ;;  %s203_s7 = smov 256   ;;  %s130_s6 = int_to_ptr.hbm [resolvable:$true] %s129_s6 }
   0xf   :  { %63 = vmatpush.msra.mxu0 %v37_v12  ;;  %92 = vmatpush.msra.mxu1 %v38_v13  ;;  %v31_v18 = vld [vmem:[%s340_s1 + $0x60] sm:$0xff]  ;;  %v32_v19 = vld [vmem:[%s340_s1 + $0x68] sm:$0xff]  ;;  %v29_v20 = vld [vmem:[%s340_s1 + $0x50] sm:$0xff]  ;;  %s204_s8 = smov 16  }
  0x10   :  { %148 = vmatpush.msra.mxu2 %v35_v14  ;;  %164 = vmatpush.msra.mxu3 %v36_v15  ;;  %v30_v21 = vld [vmem:[%s340_s1 + $0x58] sm:$0xff]  ;;  %v27_v22 = vld [vmem:[%s340_s1 + $0x40] sm:$0xff]  ;;  %v28_v23 = vld [vmem:[%s340_s1 + $0x48] sm:$0xff] }
  0x11   :  { %64 = vmatpush.msra.mxu0 %v35_v14  ;;  %93 = vmatpush.msra.mxu1 %v36_v15  ;;  %v25_v24 = vld [vmem:[%s340_s1 + $0x30] sm:$0xff]  ;;  %v26_v25 = vld [vmem:[%s340_s1 + $0x38] sm:$0xff]  ;;  %v23_v26 = vld [vmem:[%s340_s1 + $0x20] sm:$0xff] }
  0x12   :  { %149 = vmatpush.msra.mxu2 %v33_v16  ;;  %165 = vmatpush.msra.mxu3 %v34_v17  ;;  %v24_v27 = vld [vmem:[%s340_s1 + $0x28] sm:$0xff]  ;;  %v21_v28 = vld [vmem:[%s340_s1 + $0x10] sm:$0xff]  ;;  %v22_v29 = vld [vmem:[%s340_s1 + $0x18] sm:$0xff] }
  0x13   :  { %65 = vmatpush.msra.mxu0 %v33_v16  ;;  %94 = vmatpush.msra.mxu1 %v34_v17  ;;  %v19_v30 = vld [vmem:[%s340_s1] sm:$0xff]  ;;  %v20_v31 = vld [vmem:[%s340_s1 + $0x8] sm:$0xff]  ;;  %v17_v32 = vld [vmem:[%s339_s0 + $0x10] sm:$0xff] }
  0x14   :  { %150 = vmatpush.msra.mxu2 %v31_v18  ;;  %166 = vmatpush.msra.mxu3 %v32_v19  ;;  %v15_v33 = vld [vmem:[%s339_s0] sm:$0xff]  ;;  %v18_v34 = vld [vmem:[%s339_s0 + $0x18] sm:$0xff]  ;;  %v16_v35 = vld [vmem:[%s339_s0 + $0x8] sm:$0xff]  ;;  %s202_s0 = smov [#allocation2]  }
  0x15   :  { %66 = vmatpush.msra.mxu0 %v31_v18  ;;  %95 = vmatpush.msra.mxu1 %v32_v19  ;;  %v51_v36 = vld [vmem:[%s341_s2] sm:$0x3]  ;;  %s127_s2 = sshll.u32 %s202_s0, 4  ;;  %s128_s2 = int_to_ptr.vmem [resolvable:$true] %s127_s2 }
  0x16   :  { %151 = vmatpush.msra.mxu2 %v29_v20  ;;  %167 = vmatpush.msra.mxu3 %v30_v21  ;;  %v53_v37 = vperm.slane %v51_v36, 0  ;;  %v54_v38 = vperm.slane %v51_v36, 1 }
  0x17   :  { %67 = vmatpush.msra.mxu0 %v29_v20  ;;  %96 = vmatpush.msra.mxu1 %v30_v21 }
  0x18   :  { %152 = vmatpush.msra.mxu2 %v27_v22  ;;  %168 = vmatpush.msra.mxu3 %v28_v23 }
  0x19   :  { %68 = vmatpush.msra.mxu0 %v27_v22  ;;  %97 = vmatpush.msra.mxu1 %v28_v23 }
  0x1a   :  { %153 = vmatpush.msra.mxu2 %v25_v24  ;;  %169 = vmatpush.msra.mxu3 %v26_v25 }
  0x1b   :  { %69 = vmatpush.msra.mxu0 %v25_v24  ;;  %98 = vmatpush.msra.mxu1 %v26_v25 }
  0x1c   :  { %154 = vmatpush.msra.mxu2 %v23_v26  ;;  %170 = vmatpush.msra.mxu3 %v24_v27 }
  0x1d   :  { %70 = vmatpush.msra.mxu0 %v23_v26  ;;  %99 = vmatpush.msra.mxu1 %v24_v27 }
  0x1e   :  { %155 = vmatpush.msra.mxu2 %v21_v28  ;;  %171 = vmatpush.msra.mxu3 %v22_v29 }
  0x1f   :  { %71 = vmatpush.msra.mxu0 %v21_v28  ;;  %100 = vmatpush.msra.mxu1 %v22_v29 }
  0x20   :  { %156 = vmatpush.msra.mxu2 %v19_v30  ;;  %172 = vmatpush.msra.mxu3 %v20_v31 }
  0x21   :  { %79 = vmatmul.f32.vlgmr.msra.gmra.mxu2 %v17_v32  ;;  %108 = vmatmul.f32.vlgmr.msra.gmra.mxu3 %v17_v32 }
  0x22   :  { %72 = vmatpush.msra.mxu0 %v19_v30  ;;  %101 = vmatpush.msra.mxu1 %v20_v31 }
  0x23   :  { %73 = vmatmul.f32.vlgmr.msra.gmra.mxu0 %v15_v33  ;;  %102 = vmatmul.f32.vlgmr.msra.gmra.mxu1 %v15_v33 }
  0x29   :  { %82 = vmatmul.f32.gmra.mxu2 %v18_v34  ;;  %111 = vmatmul.f32.gmra.mxu3 %v18_v34 }
  0x2b   :  { %76 = vmatmul.f32.gmra.mxu0 %v16_v35  ;;  %105 = vmatmul.f32.gmra.mxu1 %v16_v35 }
  0xa0   :  { %v74_v39 = vpop.f32.mrf.mxu0  ;;  %v103_v40 = vpop.f32.mrf.mxu1 }
  0xa1   :  { %v75_v41 = vadd.f32 %v74_v39, %v53_v37  ;;  %v104_v42 = vadd.f32 %v103_v40, %v54_v38 }
  0xa3   :  { %115 = vst [vmem:[#allocation2] sm:$0xff] %v75_v41 }
  0xa4   :  { %v80_v43 = vpop.f32.mrf.mxu2  ;;  %116 = vst [vmem:[#allocation2 + $0x8] sm:$0xff] %v104_v42  ;;  %v109_v44 = vpop.f32.mrf.mxu3 }
  0xa5   :  { %v81_v45 = vadd.f32 %v80_v43, %v53_v37  ;;  %v110_v46 = vadd.f32 %v109_v44, %v54_v38 }
  0xa7   :  { %119 = vst [vmem:[#allocation2 + $0x20] sm:$0xff] %v81_v45 }
  0xa8   :  { %120 = vst [vmem:[#allocation2 + $0x28] sm:$0xff] %v110_v46  ;;  %v77_v47 = vpop.f32.mrf.mxu0  ;;  %v106_v48 = vpop.f32.mrf.mxu1 }
  0xa9   :  { %v78_v49 = vadd.f32 %v77_v47, %v53_v37  ;;  %v107_v50 = vadd.f32 %v106_v48, %v54_v38 }
  0xab   :  { %117 = vst [vmem:[#allocation2 + $0x10] sm:$0xff] %v78_v49 }
  0xac   :  { %v83_v51 = vpop.f32.mrf.mxu2  ;;  %118 = vst [vmem:[#allocation2 + $0x18] sm:$0xff] %v107_v50  ;;  %v112_v52 = vpop.f32.mrf.mxu3 }
  0xad   :  { %v84_v53 = vadd.f32 %v83_v51, %v53_v37  ;;  %v113_v54 = vadd.f32 %v112_v52, %v54_v38 }
  0xaf   :  { %121 = vst [vmem:[#allocation2 + $0x30] sm:$0xff] %v84_v53 }
  0xb0   :  { %122 = vst [vmem:[#allocation2 + $0x38] sm:$0xff] %v113_v54 }
  0xb1   :  { %135 = dma.vmem_to_hbm [thread:$0]  %s128_s2, 1024, %s130_s6, [#allocation3], %s203_s7, %s203_s7, %s204_s8  }
  0xb2   :  { %200 = dma.done.wait [#allocation3], 1024  }
  0xb3   :  { %201 = vsyncadd [#allocation3], 4294966272 }
  0xb4   :  { %140 = vsyncpa [#allocation3], 1 }

</bundles_post_ra>
